<compile_context>
chip_gen: v7x
topology: tpu7x:2x2x1
jax: 0.10.0
libtpu: 0.0.40
codegen_flags: <defaults>
</compile_context>

<pallas_src>
import math

import jax
import jax.numpy as jnp
from jax import lax
from jax.experimental import pallas as pl
from jax.experimental.pallas import tpu as pltpu


def _gelu_exact(x):
    # Matches torch.nn.GELU() default (erf-based, not tanh approximation).
    return 0.5 * x * (1.0 + lax.erf(x * (1.0 / math.sqrt(2.0))))


def _softplus(x):
    # Numerically stable softplus: max(x,0) + log1p(exp(-|x|))
    return jnp.maximum(x, 0.0) + jnp.log1p(jnp.exp(-jnp.abs(x)))


def encoder_kernel(x_ref, w1_ref, b1_ref, w2_ref, b2_ref,
                   w3mu_ref, b3mu_ref, w3var_ref, b3var_ref,
                   mu_ref, var_ref):
    x = x_ref[...]

    # Layer 1: Linear + GELU   (Dropout is identity in eval mode)
    h = jnp.dot(x, w1_ref[...], preferred_element_type=jnp.float32) + b1_ref[...]
    h = _gelu_exact(h)

    # Layer 2: Linear + GELU
    h = jnp.dot(h, w2_ref[...], preferred_element_type=jnp.float32) + b2_ref[...]
    h = _gelu_exact(h)

    # Layer 3: two lane-0-aligned dots instead of one dot + lane-offset slice.
    mu_ref[...] = (jnp.dot(h, w3mu_ref[...], preferred_element_type=jnp.float32)
                   + b3mu_ref[...])
    pre_var = (jnp.dot(h, w3var_ref[...], preferred_element_type=jnp.float32)
               + b3var_ref[...])
    var_ref[...] = _softplus(pre_var) + 1e-6


def encoder_forward(x, params, z_dim, *, block_b=1024):
    """x: (B, x_dim + n_cond) float32.  Returns (mu, variance), each (B, z_dim)."""
    w1, b1, w2, b2, w3, b3 = params
    B, in_dim = x.shape
    hid = w1.shape[1]

    # Split the last Linear into mu / var halves (free XLA slices at trace
    # time) so the kernel never slices at a lane offset.
    w3_mu, w3_var = w3[:, :z_dim], w3[:, z_dim:]
    b3_mu, b3_var = b3[:, :z_dim], b3[:, z_dim:]

    # Pick a batch tile: multiple of 8 (sublane), capped by B, sized well
    # under the 64 MiB v7x VMEM budget (a 1024x~32 f32 tile is ~128 KiB).
    block_b = max(8, min(block_b, B))
    block_b = (block_b // 8) * 8 if B >= 8 else B

    # Pad the batch axis so it divides the tile; padded rows are dropped below.
    n_blocks = pl.cdiv(B, block_b)
    Bp = n_blocks * block_b
    if Bp != B:
        x = jnp.pad(x, ((0, Bp - B), (0, 0)))

    mu, var = pl.pallas_call(
        encoder_kernel,
        out_shape=(
            jax.ShapeDtypeStruct((Bp, z_dim), jnp.float32),
            jax.ShapeDtypeStruct((Bp, z_dim), jnp.float32),
        ),
        grid=(n_blocks,),
        in_specs=[
            pl.BlockSpec((block_b, in_dim), lambda i: (i, 0)),   # x (pipelined)
            pl.BlockSpec((in_dim, hid),     lambda i: (0, 0)),   # w1 (resident)
            pl.BlockSpec((1, hid),          lambda i: (0, 0)),   # b1
            pl.BlockSpec((hid, hid),        lambda i: (0, 0)),   # w2
            pl.BlockSpec((1, hid),          lambda i: (0, 0)),   # b2
            pl.BlockSpec((hid, z_dim),      lambda i: (0, 0)),   # w3_mu
            pl.BlockSpec((1, z_dim),        lambda i: (0, 0)),   # b3_mu
            pl.BlockSpec((hid, z_dim),      lambda i: (0, 0)),   # w3_var
            pl.BlockSpec((1, z_dim),        lambda i: (0, 0)),   # b3_var
        ],
        out_specs=(
            pl.BlockSpec((block_b, z_dim), lambda i: (i, 0)),
            pl.BlockSpec((block_b, z_dim), lambda i: (i, 0)),
        ),
        compiler_params=pltpu.CompilerParams(
            dimension_semantics=("parallel",),
        ),
    )(x, w1, b1, w2, b2, w3_mu, b3_mu, w3_var, b3_var)

    if Bp != B:
        mu, var = mu[:B], var[:B]
    return mu, var


def xavier_normal(key, fan_in, fan_out, gain=0.1):
    # torch.nn.init.xavier_normal_ : std = gain * sqrt(2 / (fan_in + fan_out))
    std = gain * math.sqrt(2.0 / (fan_in + fan_out))
    # Stored as (in, out) -> transposed relative to PyTorch's (out, in) weight.
    return std * jax.random.normal(key, (fan_in, fan_out), dtype=jnp.float32)


def init_encoder_params(key, x_dim, n_cond, hid_dim, z_dim):
    k1, k2, k3 = jax.random.split(key, 3)
    in_dim = x_dim + n_cond
    w1 = xavier_normal(k1, in_dim, hid_dim)
    b1 = jnp.zeros((1, hid_dim), jnp.float32)
    w2 = xavier_normal(k2, hid_dim, hid_dim)
    b2 = jnp.zeros((1, hid_dim), jnp.float32)
    w3 = xavier_normal(k3, hid_dim, 2 * z_dim)
    b3 = jnp.zeros((1, 2 * z_dim), jnp.float32)
    return (w1, b1, w2, b2, w3, b3)


def encoder_ref(x, params, z_dim):
    """Pure-JAX reference for correctness checking (mirrors the torch module)."""
    w1, b1, w2, b2, w3, b3 = params
    h = _gelu_exact(x @ w1 + b1)
    h = _gelu_exact(h @ w2 + b2)
    out = h @ w3 + b3
    return out[:, :z_dim], _softplus(out[:, z_dim:]) + 1e-6


if __name__ == "__main__":
    # Small, module-consistent shapes; block_b=8 gives a 2-step batch grid so
    # the tiled/pipelined path is actually exercised.
    B, x_dim, n_cond, hid_dim, z_dim = 16, 28, 4, 32, 8

    key = jax.random.PRNGKey(0)
    k_x, k_p = jax.random.split(key)

    x = jax.random.normal(k_x, (B, x_dim + n_cond), dtype=jnp.float32)
    params = init_encoder_params(k_p, x_dim, n_cond, hid_dim, z_dim)

    mu, var = encoder_forward(x, params, z_dim, block_b=8)
    jax.block_until_ready((mu, var))

    mu_ref, var_ref = encoder_ref(x, params, z_dim)
    assert mu.shape == (B, z_dim) and var.shape == (B, z_dim)
    assert jnp.allclose(mu, mu_ref, atol=1e-5, rtol=1e-5)
    assert jnp.allclose(var, var_ref, atol=1e-5, rtol=1e-5)
    assert bool(jnp.all(var > 0.0))

    print("KERNEL_OK")
</pallas_src>

<mosaic_0001>
module attributes {stable_mosaic.version = 11 : i64} {
  func.func @encoder_kernel(%arg0: i32, %arg1: memref<8x32xf32, #tpu.memory_space<vmem>>, %arg2: memref<32x32xf32, #tpu.memory_space<vmem>>, %arg3: memref<1x32xf32, #tpu.memory_space<vmem>>, %arg4: memref<32x32xf32, #tpu.memory_space<vmem>>, %arg5: memref<1x32xf32, #tpu.memory_space<vmem>>, %arg6: memref<32x8xf32, #tpu.memory_space<vmem>>, %arg7: memref<1x8xf32, #tpu.memory_space<vmem>>, %arg8: memref<32x8xf32, #tpu.memory_space<vmem>>, %arg9: memref<1x8xf32, #tpu.memory_space<vmem>>, %arg10: memref<8x8xf32, #tpu.memory_space<vmem>>, %arg11: memref<8x8xf32, #tpu.memory_space<vmem>>) attributes {dimension_semantics = [#tpu.dimension_semantics<parallel>], iteration_bounds = array<i64: 2>, scalar_prefetch = 0 : i64, scratch_operands = 0 : i64, tpu.core_type = #tpu.core_type<tc>, window_params = [{transform_indices = @transform_0, window_bounds = array<i64: 8, 32>}, {pipeline_mode = #tpu.pipeline_mode<synchronous>, transform_indices = @transform_1, window_bounds = array<i64: 32, 32>}, {pipeline_mode = #tpu.pipeline_mode<synchronous>, transform_indices = @transform_2, window_bounds = array<i64: 1, 32>}, {pipeline_mode = #tpu.pipeline_mode<synchronous>, transform_indices = @transform_3, window_bounds = array<i64: 32, 32>}, {pipeline_mode = #tpu.pipeline_mode<synchronous>, transform_indices = @transform_4, window_bounds = array<i64: 1, 32>}, {pipeline_mode = #tpu.pipeline_mode<synchronous>, transform_indices = @transform_5, window_bounds = array<i64: 32, 8>}, {pipeline_mode = #tpu.pipeline_mode<synchronous>, transform_indices = @transform_6, window_bounds = array<i64: 1, 8>}, {pipeline_mode = #tpu.pipeline_mode<synchronous>, transform_indices = @transform_7, window_bounds = array<i64: 32, 8>}, {pipeline_mode = #tpu.pipeline_mode<synchronous>, transform_indices = @transform_8, window_bounds = array<i64: 1, 8>}, {transform_indices = @transform_9, window_bounds = array<i64: 8, 8>}, {transform_indices = @transform_10, window_bounds = array<i64: 8, 8>}]} {
    %c0 = arith.constant 0 : index
    %c0_0 = arith.constant 0 : index
    %0 = vector.load %arg1[%c0, %c0_0] : memref<8x32xf32, #tpu.memory_space<vmem>>, vector<8x32xf32>
    %c0_1 = arith.constant 0 : index
    %c0_2 = arith.constant 0 : index
    %1 = vector.load %arg2[%c0_1, %c0_2] : memref<32x32xf32, #tpu.memory_space<vmem>>, vector<32x32xf32>
    %cst = arith.constant dense<0.000000e+00> : vector<8x32xf32>
    %2 = tpu.matmul %0, %1, %cst {dimension_numbers = #tpu.dot_dimension_numbers<[1], [0], [0], [1], [0, 0, 1, 1], [], []>} : vector<8x32xf32>, vector<32x32xf32>, vector<8x32xf32> -> vector<8x32xf32>
    %c0_3 = arith.constant 0 : index
    %c0_4 = arith.constant 0 : index
    %3 = vector.load %arg3[%c0_3, %c0_4] : memref<1x32xf32, #tpu.memory_space<vmem>>, vector<1x32xf32>
    %4 = vector.broadcast %3 : vector<1x32xf32> to vector<8x32xf32>
    %5 = arith.addf %2, %4 : vector<8x32xf32>
    %cst_5 = arith.constant 5.000000e-01 : f32
    %6 = vector.broadcast %cst_5 : f32 to vector<8x32xf32>
    %7 = arith.mulf %6, %5 : vector<8x32xf32>
    %cst_6 = arith.constant 0.707106769 : f32
    %8 = vector.broadcast %cst_6 : f32 to vector<8x32xf32>
    %9 = arith.mulf %5, %8 : vector<8x32xf32>
    %10 = math.erf %9 : vector<8x32xf32>
    %cst_7 = arith.constant 1.000000e+00 : f32
    %11 = vector.broadcast %cst_7 : f32 to vector<8x32xf32>
    %12 = arith.addf %11, %10 : vector<8x32xf32>
    %13 = arith.mulf %7, %12 : vector<8x32xf32>
    %c0_8 = arith.constant 0 : index
    %c0_9 = arith.constant 0 : index
    %14 = vector.load %arg4[%c0_8, %c0_9] : memref<32x32xf32, #tpu.memory_space<vmem>>, vector<32x32xf32>
    %cst_10 = arith.constant dense<0.000000e+00> : vector<8x32xf32>
    %15 = tpu.matmul %13, %14, %cst_10 {dimension_numbers = #tpu.dot_dimension_numbers<[1], [0], [0], [1], [0, 0, 1, 1], [], []>} : vector<8x32xf32>, vector<32x32xf32>, vector<8x32xf32> -> vector<8x32xf32>
    %c0_11 = arith.constant 0 : index
    %c0_12 = arith.constant 0 : index
    %16 = vector.load %arg5[%c0_11, %c0_12] : memref<1x32xf32, #tpu.memory_space<vmem>>, vector<1x32xf32>
    %17 = vector.broadcast %16 : vector<1x32xf32> to vector<8x32xf32>
    %18 = arith.addf %15, %17 : vector<8x32xf32>
    %cst_13 = arith.constant 5.000000e-01 : f32
    %19 = vector.broadcast %cst_13 : f32 to vector<8x32xf32>
    %20 = arith.mulf %19, %18 : vector<8x32xf32>
    %cst_14 = arith.constant 0.707106769 : f32
    %21 = vector.broadcast %cst_14 : f32 to vector<8x32xf32>
    %22 = arith.mulf %18, %21 : vector<8x32xf32>
    %23 = math.erf %22 : vector<8x32xf32>
    %cst_15 = arith.constant 1.000000e+00 : f32
    %24 = vector.broadcast %cst_15 : f32 to vector<8x32xf32>
    %25 = arith.addf %24, %23 : vector<8x32xf32>
    %26 = arith.mulf %20, %25 : vector<8x32xf32>
    %c0_16 = arith.constant 0 : index
    %c0_17 = arith.constant 0 : index
    %27 = vector.load %arg6[%c0_16, %c0_17] : memref<32x8xf32, #tpu.memory_space<vmem>>, vector<32x8xf32>
    %cst_18 = arith.constant dense<0.000000e+00> : vector<8x8xf32>
    %28 = tpu.matmul %26, %27, %cst_18 {dimension_numbers = #tpu.dot_dimension_numbers<[1], [0], [0], [1], [0, 0, 1, 1], [], []>} : vector<8x32xf32>, vector<32x8xf32>, vector<8x8xf32> -> vector<8x8xf32>
    %c0_19 = arith.constant 0 : index
    %c0_20 = arith.constant 0 : index
    %29 = vector.load %arg7[%c0_19, %c0_20] : memref<1x8xf32, #tpu.memory_space<vmem>>, vector<1x8xf32>
    %30 = vector.broadcast %29 : vector<1x8xf32> to vector<8x8xf32>
    %31 = arith.addf %28, %30 : vector<8x8xf32>
    %c0_21 = arith.constant 0 : index
    %c0_22 = arith.constant 0 : index
    %32 = vector.load %arg10[%c0_21, %c0_22] : memref<8x8xf32, #tpu.memory_space<vmem>>, vector<8x8xf32>
    tpu.vector_store %arg10[%c0_21, %c0_22], %31 {strides = array<i32>} : memref<8x8xf32, #tpu.memory_space<vmem>>, vector<8x8xf32>,
    %c0_23 = arith.constant 0 : index
    %c0_24 = arith.constant 0 : index
    %33 = vector.load %arg8[%c0_23, %c0_24] : memref<32x8xf32, #tpu.memory_space<vmem>>, vector<32x8xf32>
    %cst_25 = arith.constant dense<0.000000e+00> : vector<8x8xf32>
    %34 = tpu.matmul %26, %33, %cst_25 {dimension_numbers = #tpu.dot_dimension_numbers<[1], [0], [0], [1], [0, 0, 1, 1], [], []>} : vector<8x32xf32>, vector<32x8xf32>, vector<8x8xf32> -> vector<8x8xf32>
    %c0_26 = arith.constant 0 : index
    %c0_27 = arith.constant 0 : index
    %35 = vector.load %arg9[%c0_26, %c0_27] : memref<1x8xf32, #tpu.memory_space<vmem>>, vector<1x8xf32>
    %36 = vector.broadcast %35 : vector<1x8xf32> to vector<8x8xf32>
    %37 = arith.addf %34, %36 : vector<8x8xf32>
    %cst_28 = arith.constant 0.000000e+00 : f32
    %38 = vector.broadcast %cst_28 : f32 to vector<8x8xf32>
    %39 = arith.maximumf %37, %38 : vector<8x8xf32>
    %40 = math.absf %37 : vector<8x8xf32>
    %cst_29 = arith.constant 0.000000e+00 : f32
    %41 = vector.broadcast %cst_29 : f32 to vector<8x8xf32>
    %42 = arith.subf %41, %40 : vector<8x8xf32>
    %43 = math.exp %42 : vector<8x8xf32>
    %44 = math.log1p %43 : vector<8x8xf32>
    %45 = arith.addf %39, %44 : vector<8x8xf32>
    %cst_30 = arith.constant 9.99999997E-7 : f32
    %46 = vector.broadcast %cst_30 : f32 to vector<8x8xf32>
    %47 = arith.addf %45, %46 : vector<8x8xf32>
    %c0_31 = arith.constant 0 : index
    %c0_32 = arith.constant 0 : index
    %48 = vector.load %arg11[%c0_31, %c0_32] : memref<8x8xf32, #tpu.memory_space<vmem>>, vector<8x8xf32>
    tpu.vector_store %arg11[%c0_31, %c0_32], %47 {strides = array<i32>} : memref<8x8xf32, #tpu.memory_space<vmem>>, vector<8x8xf32>,
    return
  }
  func.func @transform_0(%arg0: i32) -> (i32, i32) {
    %c0_i32 = arith.constant 0 : i32
    %c0_i32_0 = arith.constant 0 : i32
    return %arg0, %c0_i32 : i32, i32
  }
  func.func @transform_1(%arg0: i32) -> (i32, i32) {
    %c0_i32 = arith.constant 0 : i32
    %c0_i32_0 = arith.constant 0 : i32
    %c0_i32_1 = arith.constant 0 : i32
    return %c0_i32, %c0_i32_0 : i32, i32
  }
  func.func @transform_2(%arg0: i32) -> (i32, i32) {
    %c0_i32 = arith.constant 0 : i32
    %c0_i32_0 = arith.constant 0 : i32
    %c0_i32_1 = arith.constant 0 : i32
    return %c0_i32, %c0_i32_0 : i32, i32
  }
  func.func @transform_3(%arg0: i32) -> (i32, i32) {
    %c0_i32 = arith.constant 0 : i32
    %c0_i32_0 = arith.constant 0 : i32
    %c0_i32_1 = arith.constant 0 : i32
    return %c0_i32, %c0_i32_0 : i32, i32
  }
  func.func @transform_4(%arg0: i32) -> (i32, i32) {
    %c0_i32 = arith.constant 0 : i32
    %c0_i32_0 = arith.constant 0 : i32
    %c0_i32_1 = arith.constant 0 : i32
    return %c0_i32, %c0_i32_0 : i32, i32
  }
  func.func @transform_5(%arg0: i32) -> (i32, i32) {
    %c0_i32 = arith.constant 0 : i32
    %c0_i32_0 = arith.constant 0 : i32
    %c0_i32_1 = arith.constant 0 : i32
    return %c0_i32, %c0_i32_0 : i32, i32
  }
  func.func @transform_6(%arg0: i32) -> (i32, i32) {
    %c0_i32 = arith.constant 0 : i32
    %c0_i32_0 = arith.constant 0 : i32
    %c0_i32_1 = arith.constant 0 : i32
    return %c0_i32, %c0_i32_0 : i32, i32
  }
  func.func @transform_7(%arg0: i32) -> (i32, i32) {
    %c0_i32 = arith.constant 0 : i32
    %c0_i32_0 = arith.constant 0 : i32
    %c0_i32_1 = arith.constant 0 : i32
    return %c0_i32, %c0_i32_0 : i32, i32
  }
  func.func @transform_8(%arg0: i32) -> (i32, i32) {
    %c0_i32 = arith.constant 0 : i32
    %c0_i32_0 = arith.constant 0 : i32
    %c0_i32_1 = arith.constant 0 : i32
    return %c0_i32, %c0_i32_0 : i32, i32
  }
  func.func @transform_9(%arg0: i32) -> (i32, i32) {
    %c0_i32 = arith.constant 0 : i32
    %c0_i32_0 = arith.constant 0 : i32
    return %arg0, %c0_i32 : i32, i32
  }
  func.func @transform_10(%arg0: i32) -> (i32, i32) {
    %c0_i32 = arith.constant 0 : i32
    %c0_i32_0 = arith.constant 0 : i32
    return %arg0, %c0_i32 : i32, i32
  }
}

</mosaic_0001>

<bundles_post_ra>
// kernel: tpu_custom_call.1
= control target key start
LH: loop header
LB: loop body
LE: loop exit
PB: predicated region body
PF: predicated region fallthrough
CT: control target
= control target key end

     0   :  { %s1005_s13 = smov 0   ;;  %s1100_s0 = inlined_call_operand.vmem [shape: f32[16,32], index: 0, kind: input, shape index: {}]   ;;  %s1101_s1 = inlined_call_operand.vmem [shape: f32[32,32], index: 1, kind: input, shape index: {}]   ;;  %s1102_s2 = inlined_call_operand.vmem [shape: f32[1,32], index: 2, kind: input, shape index: {}]   ;;  %s1103_s3 = inlined_call_operand.vmem [shape: f32[32,32], index: 3, kind: input, shape index: {}]   ;;  %s1104_s4 = inlined_call_operand.vmem [shape: f32[1,32], index: 4, kind: input, shape index: {}]   ;;  %s1105_s5 = inlined_call_operand.vmem [shape: f32[32,8], index: 5, kind: input, shape index: {}]   ;;  %s1106_s6 = inlined_call_operand.vmem [shape: f32[1,8], index: 6, kind: input, shape index: {}]   ;;  %s1107_s7 = inlined_call_operand.vmem [shape: f32[32,8], index: 7, kind: input, shape index: {}]   ;;  %s1108_s8 = inlined_call_operand.vmem [shape: f32[1,8], index: 8, kind: input, shape index: {}]   ;;  %s1109_s9 = inlined_call_operand.vmem [shape: f32[16,8], index: 9, kind: output, shape index: {0}]   ;;  %s1110_s10 = inlined_call_operand.vmem [shape: f32[16,8], index: 10, kind: output, shape index: {1}]  }
   0x1 LB: > { %s814_s14 = sadd.s32 4294967295, %s945_s13   ;;  %p818_p0 = scmp.ge.s32.totalorder %s945_s13, 1  ;;  %s945_s13 = sphi %s1005_s13, %s21_s13  }
   0x2   : > { %p314_p1 = scmp.lt.s32.totalorder %s945_s13, 3 }
   0x4   : > { %p315_p2 = pnand %p818_p0, %p314_p1 }
   0x5   : > { %v367_v0 = vld [vmem:[%s1101_s1] sm:$0xff] (!%p315_p2)  ;;  %v368_v1 = vld [vmem:[%s1101_s1 + $0x8] sm:$0xff] (!%p315_p2)  ;;  %v369_v2 = vld [vmem:[%s1101_s1 + $0x10] sm:$0xff] (!%p315_p2)  ;;  %v947_v3 = vmov (!%p315_p2), 0.0|0.0   ;;  %vm948_vm0 = vmmov (!%p315_p2), 0   ;;  %v949_v6 = vmov (!%p315_p2), 0.0  }
   0x6   : > { %318 = sbr.rel (%p315_p2) target bundleno = 731 (0x2db), region = 56  ;;  %896 = vmatprep.subr.bf16.mxu0 (!%p315_p2), %v947_v3  ;;  %v897_v4 = vpack.c.bf16 (!%p315_p2), %v368_v1, %v367_v0  ;;  %v370_v5 = vld [vmem:[%s1101_s1 + $0x18] sm:$0xff] (!%p315_p2)  ;;  %860 = vmatprep.mubr.msk.f32.mxu0 (!%p315_p2), %vm948_vm0, %v949_v6  ;;  %p354_p3 = scmp.lt.s32.totalorder (!%p315_p2), %s814_s14, 1  ;;  %vm378_vm1 = vcmask (!%p315_p2), 261120   ;;  %v457_v9 = vld [vmem:[%s1103_s3] sm:$0xff] (!%p315_p2)  ;;  %v458_v10 = vld [vmem:[%s1103_s3 + $0x8] sm:$0xff] (!%p315_p2) }
   0x7   : > { %902 = vmatprep.subr.bf16.mxu1 (!%p315_p2), %v947_v3  ;;  %871 = vmatprep.mubr.msk.f32.mxu1 (!%p315_p2), %vm948_vm0, %v949_v6  ;;  %v900_v7 = vpack.c.bf16 (!%p315_p2), %v370_v5, %v369_v2  ;;  %v903_v11 = vpack.c.bf16 (!%p315_p2), %v458_v10, %v457_v9  ;;  %v459_v12 = vld [vmem:[%s1103_s3 + $0x10] sm:$0xff] (!%p315_p2)  ;;  %v460_v13 = vld [vmem:[%s1103_s3 + $0x18] sm:$0xff] (!%p315_p2)  ;;  %v822_v15 = vld [vmem:[%s1102_s2] ss:$0 sm:$0xff] (!%p315_p2)  ;;  %vm630_vm2 = vcmask (!%p315_p2), 64512  }
   0x8   : > { %898 = vmatpush3.bf16.msra.mxu0 (!%p315_p2), %v897_v4  ;;  %v906_v14 = vpack.c.bf16 (!%p315_p2), %v460_v13, %v459_v12  ;;  %v546_v24 = vld [vmem:[%s1105_s5] sm:$0xff] (!%p315_p2)  ;;  %v547_v25 = vld [vmem:[%s1105_s5 + $0x8] sm:$0xff] (!%p315_p2)  ;;  %v548_v30 = vld [vmem:[%s1105_s5 + $0x10] sm:$0xff] (!%p315_p2) }
   0x9   : > { %899 = vmatprep.subr.bf16.mxu0 (!%p315_p2), %v947_v3  ;;  %904 = vmatpush3.bf16.msra.mxu1 (!%p315_p2), %v903_v11  ;;  %v632_v26 = vld [vmem:[%s1107_s7] sm:$0xff] (!%p315_p2)  ;;  %v909_v27 = vpack.c.bf16 (!%p315_p2), %v547_v25, %v546_v24  ;;  %v633_v28 = vld [vmem:[%s1107_s7 + $0x8] sm:$0xff] (!%p315_p2)  ;;  %v549_v31 = vld [vmem:[%s1105_s5 + $0x18] sm:$0xff] (!%p315_p2) }
   0xa   : > { %905 = vmatprep.subr.bf16.mxu1 (!%p315_p2), %v947_v3  ;;  %v915_v29 = vpack.c.bf16 (!%p315_p2), %v633_v28, %v632_v26  ;;  %v634_v32 = vld [vmem:[%s1107_s7 + $0x10] sm:$0xff] (!%p315_p2)  ;;  %v912_v33 = vpack.c.bf16 (!%p315_p2), %v549_v31, %v548_v30  ;;  %v635_v34 = vld [vmem:[%s1107_s7 + $0x18] sm:$0xff] (!%p315_p2)  ;;  %v824_v36 = vld [vmem:[%s1104_s4] ss:$0 sm:$0xff] (!%p315_p2) }
   0xb   : > { %v918_v35 = vpack.c.bf16 (!%p315_p2), %v635_v34, %v634_v32  ;;  %v826_v45 = vld [vmem:[%s1106_s6] ss:$0 sm:$0xff] (!%p315_p2) }
   0xc   : > { %901 = vmatpush3.bf16.msra.mxu0 (!%p315_p2), %v900_v7  ;;  %v828_v46 = vld [vmem:[%s1108_s8] ss:$0 sm:$0xff] (!%p315_p2) }
   0xd   : > { %s1112_s14 = smov (!%p354_p3, %s814_s14), 1  ;;  %908 = vmatprep.subr.bf16.mxu0 %v947_v3  ;;  %907 = vmatpush3.bf16.msra.mxu1 %v906_v14 }
   0xe   : > { %s1027_s23 = sshll.u32 %s1112_s14, 3  ;;  %914 = vmatprep.subr.bf16.mxu1 %v947_v3 }
   0xf   : > { %s357_s26 = scalar_lea.vmem %s1100_s0, %s1027_s23  ;;  %s361_s25 = scalar_lea.vmem %s1109_s9, %s1027_s23 }
  0x10   : > { %v366_v8 = vld [vmem:[%s357_s26] sm:$0xff]  ;;  %s365_s28 = scalar_lea.vmem %s1110_s10, %s1027_s23 }
  0x11   : > { %861 = vmatmul.mubr.msk.f32.vlgmr.msra.gmra.mrb[0].mxu0 %vm378_vm1, %v366_v8 }
  0x12   : > { %882 = vmatprep.mubr.msk.f32.mxu0 %vm948_vm0, %v949_v6  ;;  %910 = vmatpush3.bf16.msra.mxu0 %v909_v27 }
  0x13   : > { %911 = vmatprep.subr.bf16.mxu0 %v947_v3 }
  0x16   : > { %913 = vmatpush3.bf16.msra.mxu0 %v912_v33 }
  0xe4   : > { %v448_v16 = vpop.f32.mrb[0].mxu0 }
  0xe5   : > { %v449_v17 = vadd.f32 %v822_v15, %v448_v16  ;;  %v862_v18 = vpop.f32.mrb[1].mxu0 }
  0xe7   : > { %v453_v19 = vmul.f32 0.70710677, %v449_v17  ;;  %v452_v21 = vmul.f32 0.5, %v449_v17 }
  0xe9   : > { %931 = verf.f32 %v453_v19 }
  0xf3   : > { %v932_v20 = vpop.eup %931 }
  0xf4   : > { %v455_v22 = vadd.f32 1.0, %v932_v20 }
  0xf6   : > { %v456_v23 = vmul.f32 %v455_v22, %v452_v21 }
  0xf8   : > { %872 = vmatmul.mubr.msk.f32.vlgmr.msra.gmra.mrb[0].mxu1 %vm378_vm1, %v456_v23 }
  0xf9   : > { %893 = vmatprep.mubr.msk.f32.mxu1 %vm948_vm0, %v949_v6  ;;  %916 = vmatpush3.bf16.msra.mxu1 %v915_v29 }
  0xfa   : > { %917 = vmatprep.subr.bf16.mxu1 %v947_v3 }
  0xfd   : > { %919 = vmatpush3.bf16.msra.mxu1 %v918_v35 }
 0x1cb   : > { %v537_v37 = vpop.f32.mrb[0].mxu1 }
 0x1cc   : > { %v538_v38 = vadd.f32 %v824_v36, %v537_v37  ;;  %v873_v39 = vpop.f32.mrb[1].mxu1 }
 0x1ce   : > { %v542_v40 = vmul.f32 0.70710677, %v538_v38  ;;  %v541_v42 = vmul.f32 0.5, %v538_v38 }
 0x1d0   : > { %933 = verf.f32 %v542_v40 }
 0x1da   : > { %v934_v41 = vpop.eup %933 }
 0x1db   : > { %v544_v43 = vadd.f32 1.0, %v934_v41 }
 0x1dd   : > { %v545_v44 = vmul.f32 %v544_v43, %v541_v42 }
 0x1df   : > { %883 = vmatmul.mubr.msk.f32.vlgmr.msra.gmra.mrb[2].mxu0 %vm378_vm1, %v545_v44  ;;  %894 = vmatmul.mubr.msk.f32.vlgmr.msra.gmra.mrb[2].mxu1 %vm378_vm1, %v545_v44 }
 0x2b2   : > { %v626_v47 = vpop.f32.mrb[2].mxu0  ;;  %v709_v48 = vpop.f32.mrb[2].mxu1 }
 0x2b3   : > { %v627_v49 = vadd.f32 %v826_v45, %v626_v47  ;;  %v710_v50 = vadd.f32 %v828_v46, %v709_v48  ;;  %v884_v51 = vpop.f32.mrb[3].mxu0  ;;  %v895_v52 = vpop.f32.mrb[3].mxu1 }
 0x2b5   : > { %631 = vst.msk [vmem:[%s361_s25] sm:$0xff] %vm630_vm2, %v627_v49  ;;  %v714_v53 = vand.u32 2147483647, %v710_v50  ;;  %v713_v0 = vmax.f32 %v710_v50, 0.0 }
 0x2b7   : > { %v715_v54 = vsub.f32 0.0, %v714_v53 }
 0x2b9   : > { %v716_v55 = vmul.f32 1.442695, %v715_v54 }
 0x2bb   : > { %935 = vpow2.f32 %v716_v55 }
 0x2c5   : > { %v936_v56 = vpop.eup %935 }
 0x2c6   : > { %v718_v57 = vadd.f32 1.0, %v936_v56  ;;  %v721_v58 = vmul.f32 -0.5, %v936_v56  ;;  %v724_v60 = vand.u32 2147483647, %v936_v56 }
 0x2c8   : > { %937 = vlog2.f32 %v718_v57  ;;  %v722_v59 = vadd.f32 1.0, %v721_v58  ;;  %vm725_vm3 = vcmp.lt.f32.partialorder %v724_v60, 0.0004427343 }
 0x2ca   : > { %v723_v63 = vmul.f32 %v936_v56, %v722_v59 }
 0x2d2   : > { %v938_v61 = vpop.eup %937 }
 0x2d3   : > { %v720_v62 = vmul.f32 0.6931472, %v938_v61 }
 0x2d5   : > { %v726_v1 = vsel %vm725_vm3, %v723_v63, %v720_v62 }
 0x2d6   : > { %v727_v2 = vadd.f32 %v726_v1, %v713_v0 }
 0x2d8   : > { %v728_v3 = vadd.f32 1e-06, %v727_v2 }
 0x2da   : > { %729 = vst.msk [vmem:[%s365_s28] sm:$0xff] %vm630_vm2, %v728_v3 }
 0x2db PF: > { %s21_s13 = sadd.s32 1, %s945_s13  }
 0x2dc   : > { %p18_p4 = scmp.ge.s32.totalorder %s21_s13, 4  }
 0x2de   :  { %20 = sbr.rel (!%p18_p4) target bundleno = 1 (0x1), region = 98 }

</bundles_post_ra>
